<compile_context>
chip_gen: v7x
topology: tpu7x:2x2x1
jax: 0.10.0
libtpu: 0.0.40
codegen_flags: <defaults>
</compile_context>

<pallas_src>
import jax
import jax.numpy as jnp
from jax.experimental import pallas as pl
from jax.experimental.pallas import tpu as pltpu


def _round_up(x, m):
    return ((x + m - 1) // m) * m


def _vmem_limit_bytes():
    """Generation-dispatched VMEM budget (leave ~25% headroom for compiler scratch)."""
    cap = None
    try:
        info = pltpu.get_tpu_info()
        for name in ("vmem_capacity_bytes", "vmem_bytes", "vmem_size_bytes"):
            if hasattr(info, name):
                cap = int(getattr(info, name))
                break
    except Exception:
        cap = None
    if not cap:
        cap = 64 * 1024 * 1024  # v7x per-TC VMEM: the most restrictive case
    return min(cap * 3 // 4, 100 * 1024 * 1024)


# ---------------------------------------------------------------------------
# Kernels.
#   B = (A + I)^T              [N_pad, N_pad] bf16
#   m = (W1 @ X^T) * d         [H_pad, N_pad] bf16   (source-side D^{-1/2} pre-applied)
#   d = deg^{-1/2}             [1, N_pad] f32        (destination-side, applied in-kernel)
# Grid = (node tiles, contraction tiles); contraction axis is innermost ("arbitrary").
# ---------------------------------------------------------------------------
def gcn_layer1_kernel(b_ref, m_ref, b1_ref, w2_ref, d_tile_ref, s_ref, acc_ref):
    k = pl.program_id(1)

    @pl.when(k == 0)
    def _():
        acc_ref[...] = jnp.zeros_like(acc_ref)

    # Normalized neighborhood aggregation: bf16 MXU matmul, f32 accumulation.
    acc_ref[...] += jnp.dot(m_ref[...], b_ref[...],
                            preferred_element_type=jnp.float32)       # (H, TM)

    @pl.when(k == pl.num_programs(1) - 1)
    def _():
        h_t = jnp.maximum(acc_ref[...] * d_tile_ref[...] + b1_ref[...], 0.0)  # h^T tile
        # Layer-2 projection (h @ W2^T)^T as a VPU sublane reduction: h never hits HBM,
        # no 1-wide MXU result. Output is lane-dense (1, TM).
        s = jnp.sum(h_t * w2_ref[...], axis=0, keepdims=True)          # (1, TM)
        s_ref[...] = s * d_tile_ref[...]


def gcn_layer2_kernel(b_ref, s_ref, d_tile_ref, b2_ref, y_ref, acc_ref):
    k = pl.program_id(1)

    @pl.when(k == 0)
    def _():
        acc_ref[...] = jnp.zeros_like(acc_ref)

    acc_ref[...] += jnp.dot(s_ref[...].astype(jnp.bfloat16), b_ref[...],
                            preferred_element_type=jnp.float32)        # (1, TM)

    @pl.when(k == pl.num_programs(1) - 1)
    def _():
        y_ref[...] = jax.nn.sigmoid(acc_ref[...] * d_tile_ref[...] + b2_ref[...])


# ---------------------------------------------------------------------------
# Wrapper.
# ---------------------------------------------------------------------------
def transaction_gnn_forward(x, edge_index, params):
    """x: [N, C] f32, edge_index: [2, E] int32 -> [N, 1] f32."""
    n, c = x.shape
    w1 = params["w1"]          # [hidden, in]   (PyTorch GCNConv lin.weight layout)
    b1 = params["b1"]          # [hidden]
    w2 = params["w2"]          # [1, hidden]
    b2 = params["b2"]          # [1]
    hidden = w1.shape[0]

    # --- tiling: pick TM first, pad N up to a TM multiple -------------------
    tm = min(512, _round_up(n, 128))
    n_pad = _round_up(n, tm)
    if n_pad <= 2048:
        tk = n_pad
    elif n_pad % 2048 == 0:
        tk = 2048
    elif n_pad % 1024 == 0:
        tk = 1024
    else:
        tk = 512
    grid = (n_pad // tm, n_pad // tk)
    h_pad = _round_up(hidden, 16)          # bf16 sublane requirement only

    # --- graph operands (plain-JAX glue: irregular edge_index scatter) ------
    # One O(N^2) pass: scatter edges + unit diagonal directly into the bf16 buffer.
    # Explicit self-loop edges are zeroed and replaced with exactly one unit loop per
    # node (PyG add_remaining_self_loops, unweighted); duplicate ordinary edges add up
    # (exact in bf16 for small integer multiplicities).
    src, dst = edge_index[0], edge_index[1]
    ew = jnp.where(src != dst, 1.0, 0.0).astype(jnp.float32)
    rows = jnp.arange(n, dtype=edge_index.dtype)
    all_src = jnp.concatenate([src, rows])
    all_dst = jnp.concatenate([dst, rows])
    all_w = jnp.concatenate([ew, jnp.ones((n,), jnp.float32)])

    b_bf16 = jnp.zeros((n_pad, n_pad), jnp.bfloat16).at[all_src, all_dst].add(
        all_w.astype(jnp.bfloat16))                                    # (A+I)^T

    # Degrees via segment_sum over edges (no dense O(N^2) reduction).
    deg = jax.ops.segment_sum(all_w, all_dst, num_segments=n_pad)
    d_inv_sqrt = jnp.where(deg > 0.0, jax.lax.rsqrt(deg), 0.0)
    d_row = d_inv_sqrt.reshape(1, n_pad)

    # Hoisted feature transform: m = (W1 @ X^T) * d, computed once, bf16 resident.
    xs = x.astype(jnp.float32) * d_inv_sqrt[:n, None]                   # scale on source
    xw1 = xs @ w1.T                                                     # (n, hidden)
    m_bf16 = (jnp.zeros((h_pad, n_pad), jnp.float32)
              .at[:hidden, :n].set(xw1.T)).astype(jnp.bfloat16)         # (H_pad, N_pad)

    b1_p = jnp.zeros((h_pad, 1), jnp.float32).at[:hidden, 0].set(b1)
    w2_p = jnp.zeros((h_pad, 1), jnp.float32).at[:hidden, 0].set(w2[0])
    b2_p = jnp.asarray(b2, jnp.float32).reshape(1, 1)

    cparams = pltpu.CompilerParams(
        dimension_semantics=("parallel", "arbitrary"),   # node axis sharded over 2 TCs
        vmem_limit_bytes=_vmem_limit_bytes(),
    )

    # Layer 1 (+ fused layer-2 projection): emits s = d .* (h @ W2^T), lane-dense.
    s_rowvec = pl.pallas_call(
        gcn_layer1_kernel,
        out_shape=jax.ShapeDtypeStruct((1, n_pad), jnp.float32),
        grid=grid,
        in_specs=[
            pl.BlockSpec((tk, tm), lambda i, k: (k, i)),      # B tile
            pl.BlockSpec((h_pad, tk), lambda i, k: (0, k)),   # m (hoisted transform)
            pl.BlockSpec((h_pad, 1), lambda i, k: (0, 0)),    # b1 (column)
            pl.BlockSpec((h_pad, 1), lambda i, k: (0, 0)),    # W2 (column)
            pl.BlockSpec((1, tm), lambda i, k: (0, i)),       # d (this node tile)
        ],
        out_specs=pl.BlockSpec((1, tm), lambda i, k: (0, i)),
        scratch_shapes=[pltpu.VMEM((h_pad, tm), jnp.float32)],
        compiler_params=cparams,
    )(b_bf16, m_bf16, b1_p, w2_p, d_row)

    # Layer 2: normalized aggregation of s + bias + sigmoid, lane-dense output.
    y_rowvec = pl.pallas_call(
        gcn_layer2_kernel,
        out_shape=jax.ShapeDtypeStruct((1, n_pad), jnp.float32),
        grid=grid,
        in_specs=[
            pl.BlockSpec((tk, tm), lambda i, k: (k, i)),      # B tile
            pl.BlockSpec((1, tk), lambda i, k: (0, k)),       # s (contraction slice)
            pl.BlockSpec((1, tm), lambda i, k: (0, i)),       # d (this node tile)
            pl.BlockSpec((1, 1), lambda i, k: (0, 0)),        # b2
        ],
        out_specs=pl.BlockSpec((1, tm), lambda i, k: (0, i)),
        scratch_shapes=[pltpu.VMEM((1, tm), jnp.float32)],
        compiler_params=cparams,
    )(b_bf16, s_rowvec, d_row, b2_p)

    return y_rowvec[0, :n].reshape(n, 1)


# ---------------------------------------------------------------------------
# Pure-JAX f32 reference (same PyG semantics) + params.
# ---------------------------------------------------------------------------
def reference_forward(x, edge_index, params):
    n = x.shape[0]
    src, dst = edge_index[0], edge_index[1]
    ew = jnp.where(src != dst, 1.0, 0.0).astype(jnp.float32)
    a = jnp.zeros((n, n), jnp.float32).at[dst, src].add(ew)
    rows = jnp.arange(n)
    a = a.at[rows, rows].add(1.0)
    deg = jnp.sum(a, axis=1)
    d = jnp.where(deg > 0.0, 1.0 / jnp.sqrt(deg), 0.0)
    a_hat = d[:, None] * a * d[None, :]
    h = jax.nn.relu(a_hat @ (x @ params["w1"].T) + params["b1"][None, :])
    z = a_hat @ (h @ params["w2"].T) + params["b2"][None, :]
    return jax.nn.sigmoid(z)


def init_params(key, in_channels, hidden_channels):
    """Deterministic glorot-style init, PyTorch GCNConv layouts."""
    k1, k2 = jax.random.split(key)
    s1 = (6.0 / (in_channels + hidden_channels)) ** 0.5
    s2 = (6.0 / (hidden_channels + 1)) ** 0.5
    return {
        "w1": jax.random.uniform(k1, (hidden_channels, in_channels),
                                 jnp.float32, -s1, s1),
        "b1": jnp.zeros((hidden_channels,), jnp.float32),
        "w2": jax.random.uniform(k2, (1, hidden_channels),
                                 jnp.float32, -s2, s2),
        "b2": jnp.zeros((1,), jnp.float32),
    }


if __name__ == "__main__":
    key = jax.random.PRNGKey(0)
    k_x, k_e, k_p = jax.random.split(key, 3)

    num_nodes = 16
    in_channels = 4
    hidden_channels = 32
    num_edges = 40

    x = jax.random.normal(k_x, (num_nodes, in_channels), jnp.float32)
    edge_index = jax.random.randint(k_e, (2, num_edges), 0, num_nodes,
                                    dtype=jnp.int32)
    params = init_params(k_p, in_channels, hidden_channels)

    out = transaction_gnn_forward(x, edge_index, params)
    out = jax.block_until_ready(out)
    assert out.shape == (num_nodes, 1)
    assert bool(jnp.all(jnp.isfinite(out)))

    ref = reference_forward(x, edge_index, params)
    max_err = float(jnp.max(jnp.abs(out - ref)))
    assert max_err < 5e-2, f"max abs err vs f32 reference: {max_err}"
    print("KERNEL_OK")
</pallas_src>

<mosaic_0001>
module attributes {stable_mosaic.version = 11 : i64} {
  func.func @gcn_layer1_kernel(%arg0: i32, %arg1: i32, %arg2: memref<128x128xbf16, #tpu.memory_space<vmem>>, %arg3: memref<32x128xbf16, #tpu.memory_space<vmem>>, %arg4: memref<32x1xf32, #tpu.memory_space<vmem>>, %arg5: memref<32x1xf32, #tpu.memory_space<vmem>>, %arg6: memref<1x128xf32, #tpu.memory_space<vmem>>, %arg7: memref<1x128xf32, #tpu.memory_space<vmem>>, %arg8: memref<32x128xf32, #tpu.memory_space<vmem>>) attributes {dimension_semantics = [#tpu.dimension_semantics<parallel>, #tpu.dimension_semantics<arbitrary>], iteration_bounds = array<i64: 1, 1>, scalar_prefetch = 0 : i64, scratch_operands = 1 : i64, tpu.core_type = #tpu.core_type<tc>, window_params = [{transform_indices = @transform_0, window_bounds = array<i64: 128, 128>}, {transform_indices = @transform_1, window_bounds = array<i64: 32, 128>}, {pipeline_mode = #tpu.pipeline_mode<synchronous>, transform_indices = @transform_2, window_bounds = array<i64: 32, 1>}, {pipeline_mode = #tpu.pipeline_mode<synchronous>, transform_indices = @transform_3, window_bounds = array<i64: 32, 1>}, {transform_indices = @transform_4, window_bounds = array<i64: 1, 128>}, {transform_indices = @transform_5, window_bounds = array<i64: 1, 128>}]} {
    %c0_i32 = arith.constant 0 : i32
    %0 = arith.cmpi eq, %arg1, %c0_i32 : i32
    %1 = arith.extui %0 : i1 to i32
    %c0_i32_0 = arith.constant 0 : i32
    %2 = arith.cmpi ne, %1, %c0_i32_0 : i32
    scf.if %2 {
      %cst_10 = arith.constant 0.000000e+00 : f32
      %12 = vector.broadcast %cst_10 : f32 to vector<32x128xf32>
      %c0_11 = arith.constant 0 : index
      %c0_12 = arith.constant 0 : index
      %13 = vector.load %arg8[%c0_11, %c0_12] : memref<32x128xf32, #tpu.memory_space<vmem>>, vector<32x128xf32>
      tpu.vector_store %arg8[%c0_11, %c0_12], %12 {strides = array<i32>} : memref<32x128xf32, #tpu.memory_space<vmem>>, vector<32x128xf32>,
    } else {
    }
    %c0 = arith.constant 0 : index
    %c0_1 = arith.constant 0 : index
    %3 = vector.load %arg8[%c0, %c0_1] : memref<32x128xf32, #tpu.memory_space<vmem>>, vector<32x128xf32>
    %c0_2 = arith.constant 0 : index
    %c0_3 = arith.constant 0 : index
    %4 = vector.load %arg3[%c0_2, %c0_3] : memref<32x128xbf16, #tpu.memory_space<vmem>>, vector<32x128xbf16>
    %c0_4 = arith.constant 0 : index
    %c0_5 = arith.constant 0 : index
    %5 = vector.load %arg2[%c0_4, %c0_5] : memref<128x128xbf16, #tpu.memory_space<vmem>>, vector<128x128xbf16>
    %cst = arith.constant dense<0.000000e+00> : vector<32x128xf32>
    %6 = tpu.matmul %4, %5, %cst {dimension_numbers = #tpu.dot_dimension_numbers<[1], [0], [0], [1], [0, 0, 1, 1], [], []>} : vector<32x128xbf16>, vector<128x128xbf16>, vector<32x128xf32> -> vector<32x128xf32>
    %7 = arith.addf %3, %6 : vector<32x128xf32>
    %c0_6 = arith.constant 0 : index
    %c0_7 = arith.constant 0 : index
    %8 = vector.load %arg8[%c0_6, %c0_7] : memref<32x128xf32, #tpu.memory_space<vmem>>, vector<32x128xf32>
    tpu.vector_store %arg8[%c0_6, %c0_7], %7 {strides = array<i32>} : memref<32x128xf32, #tpu.memory_space<vmem>>, vector<32x128xf32>,
    %c0_i32_8 = arith.constant 0 : i32
    %9 = arith.cmpi eq, %arg1, %c0_i32_8 : i32
    %10 = arith.extui %9 : i1 to i32
    %c0_i32_9 = arith.constant 0 : i32
    %11 = arith.cmpi ne, %10, %c0_i32_9 : i32
    scf.if %11 {
      %c0_10 = arith.constant 0 : index
      %c0_11 = arith.constant 0 : index
      %12 = vector.load %arg8[%c0_10, %c0_11] : memref<32x128xf32, #tpu.memory_space<vmem>>, vector<32x128xf32>
      %c0_12 = arith.constant 0 : index
      %c0_13 = arith.constant 0 : index
      %13 = vector.load %arg6[%c0_12, %c0_13] : memref<1x128xf32, #tpu.memory_space<vmem>>, vector<1x128xf32>
      %14 = vector.broadcast %13 : vector<1x128xf32> to vector<32x128xf32>
      %15 = arith.mulf %12, %14 : vector<32x128xf32>
      %c0_14 = arith.constant 0 : index
      %c0_15 = arith.constant 0 : index
      %16 = vector.load %arg4[%c0_14, %c0_15] : memref<32x1xf32, #tpu.memory_space<vmem>>, vector<32x1xf32>
      %17 = vector.broadcast %16 : vector<32x1xf32> to vector<32x128xf32>
      %18 = arith.addf %15, %17 : vector<32x128xf32>
      %cst_16 = arith.constant 0.000000e+00 : f32
      %19 = vector.broadcast %cst_16 : f32 to vector<32x128xf32>
      %20 = arith.maximumf %18, %19 : vector<32x128xf32>
      %c0_17 = arith.constant 0 : index
      %c0_18 = arith.constant 0 : index
      %21 = vector.load %arg5[%c0_17, %c0_18] : memref<32x1xf32, #tpu.memory_space<vmem>>, vector<32x1xf32>
      %22 = vector.broadcast %21 : vector<32x1xf32> to vector<32x128xf32>
      %23 = arith.mulf %20, %22 : vector<32x128xf32>
      %cst_19 = arith.constant dense<0.000000e+00> : vector<128xf32>
      %24 = vector.multi_reduction <add>, %23, %cst_19 [0] : vector<32x128xf32> to vector<128xf32>
      %25 = vector.shape_cast %24 : vector<128xf32> to vector<1x128xf32>
      %c0_20 = arith.constant 0 : index
      %c0_21 = arith.constant 0 : index
      %26 = vector.load %arg6[%c0_20, %c0_21] : memref<1x128xf32, #tpu.memory_space<vmem>>, vector<1x128xf32>
      %27 = arith.mulf %25, %26 : vector<1x128xf32>
      %c0_22 = arith.constant 0 : index
      %c0_23 = arith.constant 0 : index
      %28 = vector.load %arg7[%c0_22, %c0_23] : memref<1x128xf32, #tpu.memory_space<vmem>>, vector<1x128xf32>
      tpu.vector_store %arg7[%c0_22, %c0_23], %27 {strides = array<i32>} : memref<1x128xf32, #tpu.memory_space<vmem>>, vector<1x128xf32>,
    } else {
    }
    return
  }
  func.func @transform_0(%arg0: i32, %arg1: i32) -> (i32, i32) {
    %c0_i32 = arith.constant 0 : i32
    return %arg1, %arg0 : i32, i32
  }
  func.func @transform_1(%arg0: i32, %arg1: i32) -> (i32, i32) {
    %c0_i32 = arith.constant 0 : i32
    %c0_i32_0 = arith.constant 0 : i32
    return %c0_i32, %arg1 : i32, i32
  }
  func.func @transform_2(%arg0: i32, %arg1: i32) -> (i32, i32) {
    %c0_i32 = arith.constant 0 : i32
    %c0_i32_0 = arith.constant 0 : i32
    %c0_i32_1 = arith.constant 0 : i32
    return %c0_i32, %c0_i32_0 : i32, i32
  }
  func.func @transform_3(%arg0: i32, %arg1: i32) -> (i32, i32) {
    %c0_i32 = arith.constant 0 : i32
    %c0_i32_0 = arith.constant 0 : i32
    %c0_i32_1 = arith.constant 0 : i32
    return %c0_i32, %c0_i32_0 : i32, i32
  }
  func.func @transform_4(%arg0: i32, %arg1: i32) -> (i32, i32) {
    %c0_i32 = arith.constant 0 : i32
    %c0_i32_0 = arith.constant 0 : i32
    return %c0_i32, %arg0 : i32, i32
  }
  func.func @transform_5(%arg0: i32, %arg1: i32) -> (i32, i32) {
    %c0_i32 = arith.constant 0 : i32
    %c0_i32_0 = arith.constant 0 : i32
    return %c0_i32, %arg0 : i32, i32
  }
}

</mosaic_0001>

<bundles_post_ra>
// kernel: tpu_custom_call.1
= control target key start
LH: loop header
LB: loop body
LE: loop exit
PB: predicated region body
PF: predicated region fallthrough
CT: control target
= control target key end

     0   :  { %10 = vsyncpa [#allocation4], 0  ;;  %s504_s0 = inlined_call_operand.vmem [shape: bf16[128,128], index: 0, kind: input, shape index: {}]   ;;  %s505_s1 = inlined_call_operand.hbm [shape: bf16[32,128], index: 1, kind: input, shape index: {}]   ;;  %s506_s2 = inlined_call_operand.vmem [shape: f32[32,1], index: 2, kind: input, shape index: {}]   ;;  %s507_s3 = inlined_call_operand.vmem [shape: f32[32,1], index: 3, kind: input, shape index: {}]   ;;  %s508_s4 = inlined_call_operand.vmem [shape: f32[1,128], index: 4, kind: input, shape index: {}]   ;;  %s509_s5 = inlined_call_operand.hbm [shape: f32[1,128], index: 5, kind: output, shape index: {}]  }
   0x1   :  { %11 = vsyncpa [#allocation5], 0  ;;  %s394_s18 = smov [#allocation3]   ;;  %s346_s22 = scalar_lea.hbm %s505_s1, 256 }
   0x2   :  { %s19_s19 = sshll.u32 %s394_s18, 4  ;;  %p347_p0 = scmp.ne.s32.totalorder %s505_s1, %s346_s22  ;;  %s20_s19 = int_to_ptr.vmem [resolvable:$true] %s19_s19 }
   0x3   :  { %p350_p1 = scmp.lt.u32.totalorder %s346_s22, %s505_s1 }
   0x5   :  { %p352_p2 = pnand %p350_p1, %p347_p0 }
   0x7   :  { %355 = shalt.err (!%p352_p2)
}
   0x8   :  { %s356_s27 = scalar_lea.vmem %s20_s19, 256  ;;  %p361_p4 = scmp.lt.s32.totalorder %s20_s19, %s20_s19 }
   0x9   :  { %p357_p3 = scmp.ne.s32.totalorder %s20_s19, %s356_s27  ;;  %p362_p5 = scmp.lt.s32.totalorder %s356_s27, %s356_s27 }
   0xb   :  { %p363_p6 = por %p362_p5, %p361_p4 }
   0xd   :  { %p364_p7 = pnand %p363_p6, %p357_p3 }
   0xf   :  { %367 = shalt.err (!%p364_p7)
}
  0x10   :  { %s395_s28 = smov 64   ;;  %s396_s29 = smov 4  }
  0x11   :  { %25 = dma.hbm_to_vmem [thread:$0]  %s505_s1, 256, %s20_s19, [#allocation4], %s395_s28, %s395_s28, %s396_s29  }
  0x12   :  { %390 = dma.done.wait [#allocation4], 256  }
  0x13   :  { %391 = vsyncadd [#allocation4], 4294967040  ;;  %v397_v0 = vmov 0   ;;  %v336_v1 = vld [vmem:[%s504_s0] sm:$0xff]   ;;  %v337_v2 = vld [vmem:[%s504_s0 + $0x8] sm:$0xff]   ;;  %v194_v19 = vlaneseq }
  0x14   :  { %334 = vset.pattern.permute.xlu0 %v397_v0  ;;  %335 = vset.pattern.permute.xlu1 %v397_v0  ;;  %v338_v3 = vld [vmem:[%s504_s0 + $0x10] sm:$0xff]   ;;  %v339_v4 = vld [vmem:[%s504_s0 + $0x18] sm:$0xff]   ;;  %v344_v5 = vld [vmem:[#allocation3] sm:$0xff]  }
  0x15   :  { %309 = vmatprep.subr.bf16.mxu0 %v336_v1  ;;  %325 = vmatprep.mubr.bf16.mxu0 %v344_v5  ;;  %v203_v6 = vld [vmem:[%s506_s2] sm:$0xff]  ;;  %v205_v7 = vld [vmem:[%s506_s2 + $0x10] sm:$0xff]  ;;  %v204_v9 = vld [vmem:[%s506_s2 + $0x8] sm:$0xff]  ;;  %v195_v20 = vshrl.u32 %v194_v19, 7 }
  0x16   :  { %310 = vmatpush3.bf16.msra.mxu0 %v336_v1  ;;  %209 = vperm.xlu0 %334, %v203_v6   ;;  %v340_v8 = vld [vmem:[%s504_s0 + $0x20] sm:$0xff]   ;;  %v206_v10 = vld [vmem:[%s506_s2 + $0x18] sm:$0xff]  ;;  %v341_v11 = vld [vmem:[%s504_s0 + $0x28] sm:$0xff]  }
  0x17   :  { %311 = vmatprep.subr.bf16.mxu0 %v337_v2  ;;  %219 = vperm.xlu1 %335, %v205_v7   ;;  %v235_v12 = vld [vmem:[%s507_s3] sm:$0xff]  ;;  %v236_v13 = vld [vmem:[%s507_s3 + $0x8] sm:$0xff]  ;;  %v342_v14 = vld [vmem:[%s504_s0 + $0x30] sm:$0xff]   ;;  %v196_v22 = vsub.s32 0, %v195_v20 }
  0x18   :  { %v237_v15 = vld [vmem:[%s507_s3 + $0x10] sm:$0xff]  ;;  %v238_v16 = vld [vmem:[%s507_s3 + $0x18] sm:$0xff]  ;;  %v345_v18 = vld [vmem:[#allocation3 + $0x8] sm:$0xff]  }
  0x19   :  { %v343_v17 = vld [vmem:[%s504_s0 + $0x38] sm:$0xff]   ;;  %v192_v23 = vld [vmem:[%s508_s4] sm:$0x1]  ;;  %s398_s0 = smov [#allocation6]  }
  0x1a   :  { %312 = vmatpush3.bf16.msra.mxu0 %v337_v2  ;;  %214 = vperm.xlu0 %334, %v204_v9   ;;  %v197_v25 = vrot.slane %v192_v23, %v196_v22  ;;  %s280_s3 = sshll.u32 %s398_s0, 4  ;;  %s281_s3 = int_to_ptr.vmem [resolvable:$true] %s280_s3 }
  0x1b   :  { %313 = vmatprep.subr.bf16.mxu0 %v338_v3  ;;  %224 = vperm.xlu1 %335, %v206_v10   ;;  %s368_s4 = scalar_lea.vmem %s281_s3, 16  ;;  %s372_s13 = scalar_lea.vmem %s281_s3, 32 }
  0x1c   :  { %p369_p8 = scmp.ne.s32.totalorder %s281_s3, %s368_s4  ;;  %p373_p9 = scmp.lt.s32.totalorder %s281_s3, %s281_s3 }
  0x1d   :  { %p374_p10 = scmp.lt.s32.totalorder %s372_s13, %s368_s4 }
  0x1e   :  { %314 = vmatpush3.bf16.msra.mxu0 %v338_v3  ;;  %241 = vperm.xlu0 %334, %v235_v12  }
  0x1f   :  { %315 = vmatprep.subr.bf16.mxu0 %v339_v4  ;;  %246 = vperm.xlu1 %335, %v236_v13   ;;  %p375_p11 = por %p374_p10, %p373_p9 }
  0x21   :  { %p376_p12 = pnand %p375_p11, %p369_p8 }
  0x22   :  { %316 = vmatpush3.bf16.msra.mxu0 %v339_v4  ;;  %251 = vperm.xlu0 %334, %v237_v15  }
  0x23   :  { %317 = vmatprep.subr.bf16.mxu0 %v340_v8  ;;  %256 = vperm.xlu1 %335, %v238_v16  }
  0x26   :  { %318 = vmatpush3.bf16.msra.mxu0 %v340_v8 }
  0x27   :  { %319 = vmatprep.subr.bf16.mxu0 %v341_v11 }
  0x2a   :  { %320 = vmatpush3.bf16.msra.mxu0 %v341_v11 }
  0x2b   :  { %321 = vmatprep.subr.bf16.mxu0 %v342_v14 }
  0x2e   :  { %322 = vmatpush3.bf16.msra.mxu0 %v342_v14 }
  0x2f   :  { %323 = vmatprep.subr.bf16.mxu0 %v343_v17 }
  0x32   :  { %324 = vmatpush3.bf16.msra.mxu0 %v343_v17 }
  0x35   :  { %326 = vmatmul.mubr.bf16.vlgmr.msra.gmra.mrb[0].mxu0 %v345_v18 }
  0x95   :  { %v210_v21 = vpop.permute.xlu0 %209 }
  0x96   :  { %v220_v24 = vpop.permute.xlu1 %219 }
  0x99   :  { %v215_v26 = vpop.permute.xlu0 %214 }
  0x9a   :  { %v225_v28 = vpop.permute.xlu1 %224 }
  0x9d   :  { %v242_v38 = vpop.permute.xlu0 %241 }
  0x9e   :  { %v247_v42 = vpop.permute.xlu1 %246 }
  0xa1   :  { %v252_v48 = vpop.permute.xlu0 %251 }
  0xa2   :  { %v257_v51 = vpop.permute.xlu1 %256 }
 0x108   :  { %v327_v27 = vpop.f32.mrb[0].mxu0 }
 0x109   :  { %v201_v29 = vmul.f32 %v327_v27, %v197_v25  ;;  %v162_v30 = vpop.f32.mrb[1].mxu0 }
 0x10a   :  { %v199_v31 = vmul.f32 %v197_v25, %v162_v30  ;;  %v328_v32 = vpop.f32.mrb[2].mxu0 }
 0x10b   :  { %v202_v33 = vmul.f32 %v328_v32, %v197_v25  ;;  %v165_v34 = vpop.f32.mrb[3].mxu0  ;;  %v229_v35 = vadd.f32 %v220_v24, %v201_v29 }
 0x10c   :  { %v227_v36 = vadd.f32 %v210_v21, %v199_v31  ;;  %v200_v37 = vmul.f32 %v197_v25, %v165_v34 }
 0x10d   :  { %v230_v40 = vadd.f32 %v225_v28, %v202_v33  ;;  %v233_v43 = vmax.f32 %v229_v35, 0.0 }
 0x10e   :  { %v231_v39 = vmax.f32 %v227_v36, 0.0  ;;  %v228_v41 = vadd.f32 %v215_v26, %v200_v37 }
 0x10f   :  { %v234_v46 = vmax.f32 %v230_v40, 0.0  ;;  %v261_v49 = vmul.f32 %v252_v48, %v233_v43 }
 0x110   :  { %v232_v44 = vmax.f32 %v228_v41, 0.0  ;;  %v259_v45 = vmul.f32 %v242_v38, %v231_v39 }
 0x111   :  { %v262_v52 = vmul.f32 %v257_v51, %v234_v46 }
 0x112   :  { %v260_v47 = vmul.f32 %v247_v42, %v232_v44 }
 0x114   :  { %v263_v50 = vadd.f32 %v260_v47, %v259_v45 }
 0x116   :  { %v264_v53 = vadd.f32 %v263_v50, %v261_v49 }
 0x118   :  { %v265_v54 = vadd.f32 %v264_v53, %v262_v52 }
 0x11a   :  { %v266_v55 = vrot.slane %v265_v54, 4 }
 0x11c   :  { %v267_v56 = vadd.f32 %v266_v55, %v265_v54 }
 0x11e   :  { %v268_v57 = vrot.slane %v267_v56, 2 }
 0x120   :  { %v269_v58 = vadd.f32 %v268_v57, %v267_v56 }
 0x122   :  { %v270_v59 = vrot.slane %v269_v58, 1 }
 0x124   :  { %v271_v60 = vadd.f32 %v270_v59, %v269_v58 }
 0x126   :  { %v272_v61 = vmul.f32 %v271_v60, %v192_v23 }
 0x128   :  { %273 = vst [vmem:[#allocation6] sm:$0x1] %v272_v61 }
 0x129   :  { %379 = shalt.err (!%p376_p12)
}
 0x12a   :  { %s380_s16 = scalar_lea.hbm %s509_s5, 16 }
 0x12b   :  { %p381_p13 = scmp.ne.s32.totalorder %s509_s5, %s380_s16  ;;  %p384_p0 = scmp.lt.u32.totalorder %s380_s16, %s509_s5 }
 0x12d   :  { %p386_p1 = pnand %p384_p0, %p381_p13 }
 0x12f   :  { %389 = shalt.err (!%p386_p1)
}
 0x130   :  { %283 = dma.vmem_to_hbm [thread:$0]  %s281_s3, 16, %s509_s5, [#allocation5]  }
 0x131   :  { %392 = dma.done.wait [#allocation5], 16  }
 0x132   :  { %393 = vsyncadd [#allocation5], 4294967280 }
 0x133   :  { %287 = vsyncpa [#allocation4], 1 }
 0x134   :  { %288 = vsyncpa [#allocation5], 1 }

</bundles_post_ra>
